<compile_context>
chip_gen: v7x
topology: tpu7x:2x2x1
jax: 0.10.0
libtpu: 0.0.40
codegen_flags: <defaults>
</compile_context>

<pallas_src>
import functools

import jax
import jax.numpy as jnp
from jax.experimental import pallas as pl
from jax.experimental.pallas import tpu as pltpu

_LANE = 128       # vreg lane width / MXU column granularity
_SUBLANE = 8      # f32 sublane granularity
_ROW_ALIGN = 16   # bf16 sublane packing (output tile is bf16) -> row blocks of 16


def _round_up(v, m):
    return ((v + m - 1) // m) * m


def _decoder_roi_kernel(x_ref, w1_ref, b1_ref, w2_ref, b2_ref, w3_ref, b3_ref,
                        o_ref, *, final_act: bool):
    # x arrives f32 (unpadded latent dim); cast to bf16 in-register for the MXU.
    x = x_ref[...].astype(jnp.bfloat16)

    h1 = jnp.dot(x, w1_ref[...], preferred_element_type=jnp.float32) + b1_ref[...]
    h1 = jnp.maximum(h1, 0.0)                                    # ReLU (VPU, f32)

    h2 = jnp.dot(h1.astype(jnp.bfloat16), w2_ref[...],
                 preferred_element_type=jnp.float32) + b2_ref[...]
    h2 = jnp.maximum(h2, 0.0)                                    # ReLU (VPU, f32)

    out = jnp.dot(h2.astype(jnp.bfloat16), w3_ref[...],
                  preferred_element_type=jnp.float32) + b3_ref[...]

    if final_act:
        # numerically-stable softplus: log1p(exp(-|x|)) + max(x, 0)
        out = jnp.log1p(jnp.exp(-jnp.abs(out))) + jnp.maximum(out, 0.0)

    o_ref[...] = out.astype(o_ref.dtype)   # bf16 lane-dense store


def prepare_params(params):
    """One-time prep: pad feature dims to lane multiples, cast weights to bf16.

    params: dict with w1 [latent, hidden//2], b1 [1, hidden//2],
                      w2 [hidden//2, hidden], b2 [1, hidden],
                      w3 [hidden, out_dim],   b3 [1, out_dim]
            (weights stored [in, out], i.e. transposed vs PyTorch's [out, in])
    Returns (prepped_params_dict, out_dim).
    """
    w1, w2, w3 = params["w1"], params["w2"], params["w3"]
    b1, b2, b3 = params["b1"], params["b2"], params["b3"]
    out_dim = w3.shape[1]

    h_half_p = _round_up(w1.shape[1], _LANE)
    hidden_p = _round_up(w2.shape[1], _LANE)
    out_p = _round_up(out_dim, _LANE)

    def pad2(a, rows, cols):
        return jnp.pad(a, ((0, rows - a.shape[0]), (0, cols - a.shape[1])))

    prepped = dict(
        # w1 keeps its unpadded latent rows (K=latent is fine on the MXU).
        w1=pad2(w1, w1.shape[0], h_half_p).astype(jnp.bfloat16),
        b1=pad2(b1.astype(jnp.float32), 1, h_half_p),
        w2=pad2(w2, h_half_p, hidden_p).astype(jnp.bfloat16),
        b2=pad2(b2.astype(jnp.float32), 1, hidden_p),
        w3=pad2(w3, hidden_p, out_p).astype(jnp.bfloat16),
        b3=pad2(b3.astype(jnp.float32), 1, out_p),
    )
    return prepped, out_dim


@functools.partial(jax.jit, static_argnames=("out_dim", "final_act", "block_b"))
def decoder_roi_forward(x, prepped, *, out_dim, final_act=False, block_b=None):
    """Fused Decoder_ROI MLP forward on TPU via Pallas.

    x:       [B, latent_dim] float32
    prepped: output of prepare_params (lane-padded, bf16 weights / f32 biases)
    """
    B, latent_dim = x.shape
    h_half_p = prepped["w1"].shape[1]
    hidden_p = prepped["w2"].shape[1]
    out_p = prepped["w3"].shape[1]

    # --- batch tiling: minimize padding; >=2 balanced tiles for non-trivial B
    #     (keeps both v7x TensorCores busy); tiles capped at ~1024 rows so
    #     v5e/v6e amortize per-step overhead with few, large steps. ---
    if block_b is None:
        if B <= _ROW_ALIGN:
            n_tiles = 1
        else:
            n_tiles = max(2, pl.cdiv(B, 1024))
        block_b = _round_up(pl.cdiv(B, n_tiles), _ROW_ALIGN)
    else:
        block_b = max(_ROW_ALIGN, _round_up(int(block_b), _ROW_ALIGN))
    B_pad = _round_up(B, block_b)
    grid = (B_pad // block_b,)

    # only pad the batch dim (latent dim stays unpadded, x stays f32)
    x_p = x if B_pad == B else jnp.pad(x, ((0, B_pad - B), (0, 0)))

    # constant index_map -> DMA'd once, resident across batch tiles
    def const(shape):
        return pl.BlockSpec(shape, lambda i: tuple(0 for _ in shape))

    kernel = functools.partial(_decoder_roi_kernel, final_act=final_act)

    # --- explicit scoped-VMEM budget (valid on v5e / v6e / v7x defaults) ---
    tile_bytes = (
        2 * block_b * latent_dim * 4                                  # x tile f32, dbl-buffered
        + 2 * block_b * out_p * 2                                     # out tile bf16, dbl-buffered
        + 2 * 2 * (latent_dim * h_half_p + h_half_p * hidden_p + hidden_p * out_p)  # weights bf16
        + 2 * 4 * _SUBLANE * (h_half_p + hidden_p + out_p)            # biases f32 (sublane-padded)
        + 4 * block_b * (h_half_p + hidden_p + out_p)                 # f32 intermediates headroom
    )
    vmem_limit = int(min(max(2 * tile_bytes, 8 << 20), 32 << 20))

    out_padded = pl.pallas_call(
        kernel,
        out_shape=jax.ShapeDtypeStruct((B_pad, out_p), jnp.bfloat16),
        grid_spec=pltpu.PrefetchScalarGridSpec(
            num_scalar_prefetch=0,
            grid=grid,
            in_specs=[
                pl.BlockSpec((block_b, latent_dim), lambda i: (i, 0)),  # x tile (full latent dim)
                const((latent_dim, h_half_p)),   # w1
                const((1, h_half_p)),            # b1
                const((h_half_p, hidden_p)),     # w2
                const((1, hidden_p)),            # b2
                const((hidden_p, out_p)),        # w3
                const((1, out_p)),               # b3
            ],
            out_specs=pl.BlockSpec((block_b, out_p), lambda i: (i, 0)),
        ),
        compiler_params=pltpu.CompilerParams(
            dimension_semantics=("parallel",),
            vmem_limit_bytes=vmem_limit,
        ),
    )(x_p, prepped["w1"], prepped["b1"], prepped["w2"], prepped["b2"],
      prepped["w3"], prepped["b3"])

    # slice away batch / lane padding; fused into this jit (single dispatch)
    return out_padded[:B, :out_dim].astype(x.dtype)


def init_params(key, latent_dim, hidden_dim, out_dim):
    h_half = hidden_dim // 2
    ks = jax.random.split(key, 6)
    scale = lambda fan_in: 1.0 / jnp.sqrt(jnp.float32(fan_in))
    # weights stored as [in, out] (transposed vs PyTorch's [out, in])
    w1 = jax.random.normal(ks[0], (latent_dim, h_half), jnp.float32) * scale(latent_dim)
    b1 = jax.random.normal(ks[1], (1, h_half), jnp.float32) * 0.01
    w2 = jax.random.normal(ks[2], (h_half, hidden_dim), jnp.float32) * scale(h_half)
    b2 = jax.random.normal(ks[3], (1, hidden_dim), jnp.float32) * 0.01
    w3 = jax.random.normal(ks[4], (hidden_dim, out_dim), jnp.float32) * scale(hidden_dim)
    b3 = jax.random.normal(ks[5], (1, out_dim), jnp.float32) * 0.01
    return dict(w1=w1, b1=b1, w2=w2, b2=b2, w3=w3, b3=b3)


def reference_forward(x, p, final_act=False):
    h1 = jnp.maximum(x @ p["w1"] + p["b1"], 0.0)
    h2 = jnp.maximum(h1 @ p["w2"] + p["b2"], 0.0)
    out = h2 @ p["w3"] + p["b3"]
    if final_act:
        out = jax.nn.softplus(out)
    return out


if __name__ == "__main__":
    # small shapes consistent with the module
    B, latent_dim, hidden_dim, out_dim = 8, 32, 64, 16

    key = jax.random.PRNGKey(0)
    kx, kp = jax.random.split(key)
    x = jax.random.normal(kx, (B, latent_dim), jnp.float32)
    params = init_params(kp, latent_dim, hidden_dim, out_dim)

    # one-time weight prep (pad to lane multiples, cast to bf16)
    prepped, out_dim_p = prepare_params(params)
    prepped = jax.tree_util.tree_map(jax.block_until_ready, prepped)

    out = jax.block_until_ready(
        decoder_roi_forward(x, prepped, out_dim=out_dim_p, final_act=True))
    ref = reference_forward(x, params, final_act=True)
    assert out.shape == (B, out_dim)
    # bf16 MXU operands / bf16 output store with f32 accumulation -> loosened tol
    assert jnp.allclose(out, ref, atol=5e-2, rtol=5e-2), (
        "mismatch vs reference, max abs err "
        f"{float(jnp.max(jnp.abs(out - ref)))}")

    # larger ragged batch exercises the multi-tile grid / batch-padding path
    B2 = 600
    x2 = jax.random.normal(jax.random.PRNGKey(1), (B2, latent_dim), jnp.float32)
    out2 = jax.block_until_ready(
        decoder_roi_forward(x2, prepped, out_dim=out_dim_p, final_act=False))
    ref2 = reference_forward(x2, params, final_act=False)
    assert out2.shape == (B2, out_dim)
    assert jnp.allclose(out2, ref2, atol=5e-2, rtol=5e-2), (
        "mismatch vs reference (tiled path), max abs err "
        f"{float(jnp.max(jnp.abs(out2 - ref2)))}")

    print("KERNEL_OK")
</pallas_src>

<mosaic_0001>
module attributes {stable_mosaic.version = 11 : i64} {
  func.func @_decoder_roi_kernel(%arg0: i32, %arg1: memref<16x32xf32, #tpu.memory_space<vmem>>, %arg2: memref<32x128xbf16, #tpu.memory_space<vmem>>, %arg3: memref<1x128xf32, #tpu.memory_space<vmem>>, %arg4: memref<128x128xbf16, #tpu.memory_space<vmem>>, %arg5: memref<1x128xf32, #tpu.memory_space<vmem>>, %arg6: memref<128x128xbf16, #tpu.memory_space<vmem>>, %arg7: memref<1x128xf32, #tpu.memory_space<vmem>>, %arg8: memref<16x128xbf16, #tpu.memory_space<vmem>>) attributes {dimension_semantics = [#tpu.dimension_semantics<parallel>], iteration_bounds = array<i64: 1>, scalar_prefetch = 0 : i64, scratch_operands = 0 : i64, tpu.core_type = #tpu.core_type<tc>, window_params = [{transform_indices = @transform_0, window_bounds = array<i64: 16, 32>}, {pipeline_mode = #tpu.pipeline_mode<synchronous>, transform_indices = @transform_1, window_bounds = array<i64: 32, 128>}, {pipeline_mode = #tpu.pipeline_mode<synchronous>, transform_indices = @transform_2, window_bounds = array<i64: 1, 128>}, {pipeline_mode = #tpu.pipeline_mode<synchronous>, transform_indices = @transform_3, window_bounds = array<i64: 128, 128>}, {pipeline_mode = #tpu.pipeline_mode<synchronous>, transform_indices = @transform_4, window_bounds = array<i64: 1, 128>}, {pipeline_mode = #tpu.pipeline_mode<synchronous>, transform_indices = @transform_5, window_bounds = array<i64: 128, 128>}, {pipeline_mode = #tpu.pipeline_mode<synchronous>, transform_indices = @transform_6, window_bounds = array<i64: 1, 128>}, {transform_indices = @transform_7, window_bounds = array<i64: 16, 128>}]} {
    %c0 = arith.constant 0 : index
    %c0_0 = arith.constant 0 : index
    %0 = vector.load %arg1[%c0, %c0_0] : memref<16x32xf32, #tpu.memory_space<vmem>>, vector<16x32xf32>
    %1 = arith.truncf %0 : vector<16x32xf32> to vector<16x32xbf16>
    %c0_1 = arith.constant 0 : index
    %c0_2 = arith.constant 0 : index
    %2 = vector.load %arg2[%c0_1, %c0_2] : memref<32x128xbf16, #tpu.memory_space<vmem>>, vector<32x128xbf16>
    %cst = arith.constant dense<0.000000e+00> : vector<16x128xf32>
    %3 = tpu.matmul %1, %2, %cst {dimension_numbers = #tpu.dot_dimension_numbers<[1], [0], [0], [1], [0, 0, 1, 1], [], []>} : vector<16x32xbf16>, vector<32x128xbf16>, vector<16x128xf32> -> vector<16x128xf32>
    %c0_3 = arith.constant 0 : index
    %c0_4 = arith.constant 0 : index
    %4 = vector.load %arg3[%c0_3, %c0_4] : memref<1x128xf32, #tpu.memory_space<vmem>>, vector<1x128xf32>
    %5 = vector.broadcast %4 : vector<1x128xf32> to vector<16x128xf32>
    %6 = arith.addf %3, %5 : vector<16x128xf32>
    %cst_5 = arith.constant 0.000000e+00 : f32
    %7 = vector.broadcast %cst_5 : f32 to vector<16x128xf32>
    %8 = arith.maximumf %6, %7 : vector<16x128xf32>
    %9 = arith.truncf %8 : vector<16x128xf32> to vector<16x128xbf16>
    %c0_6 = arith.constant 0 : index
    %c0_7 = arith.constant 0 : index
    %10 = vector.load %arg4[%c0_6, %c0_7] : memref<128x128xbf16, #tpu.memory_space<vmem>>, vector<128x128xbf16>
    %cst_8 = arith.constant dense<0.000000e+00> : vector<16x128xf32>
    %11 = tpu.matmul %9, %10, %cst_8 {dimension_numbers = #tpu.dot_dimension_numbers<[1], [0], [0], [1], [0, 0, 1, 1], [], []>} : vector<16x128xbf16>, vector<128x128xbf16>, vector<16x128xf32> -> vector<16x128xf32>
    %c0_9 = arith.constant 0 : index
    %c0_10 = arith.constant 0 : index
    %12 = vector.load %arg5[%c0_9, %c0_10] : memref<1x128xf32, #tpu.memory_space<vmem>>, vector<1x128xf32>
    %13 = vector.broadcast %12 : vector<1x128xf32> to vector<16x128xf32>
    %14 = arith.addf %11, %13 : vector<16x128xf32>
    %cst_11 = arith.constant 0.000000e+00 : f32
    %15 = vector.broadcast %cst_11 : f32 to vector<16x128xf32>
    %16 = arith.maximumf %14, %15 : vector<16x128xf32>
    %17 = arith.truncf %16 : vector<16x128xf32> to vector<16x128xbf16>
    %c0_12 = arith.constant 0 : index
    %c0_13 = arith.constant 0 : index
    %18 = vector.load %arg6[%c0_12, %c0_13] : memref<128x128xbf16, #tpu.memory_space<vmem>>, vector<128x128xbf16>
    %cst_14 = arith.constant dense<0.000000e+00> : vector<16x128xf32>
    %19 = tpu.matmul %17, %18, %cst_14 {dimension_numbers = #tpu.dot_dimension_numbers<[1], [0], [0], [1], [0, 0, 1, 1], [], []>} : vector<16x128xbf16>, vector<128x128xbf16>, vector<16x128xf32> -> vector<16x128xf32>
    %c0_15 = arith.constant 0 : index
    %c0_16 = arith.constant 0 : index
    %20 = vector.load %arg7[%c0_15, %c0_16] : memref<1x128xf32, #tpu.memory_space<vmem>>, vector<1x128xf32>
    %21 = vector.broadcast %20 : vector<1x128xf32> to vector<16x128xf32>
    %22 = arith.addf %19, %21 : vector<16x128xf32>
    %23 = math.absf %22 : vector<16x128xf32>
    %cst_17 = arith.constant 0.000000e+00 : f32
    %24 = vector.broadcast %cst_17 : f32 to vector<16x128xf32>
    %25 = arith.subf %24, %23 : vector<16x128xf32>
    %26 = math.exp %25 : vector<16x128xf32>
    %27 = math.log1p %26 : vector<16x128xf32>
    %cst_18 = arith.constant 0.000000e+00 : f32
    %28 = vector.broadcast %cst_18 : f32 to vector<16x128xf32>
    %29 = arith.maximumf %22, %28 : vector<16x128xf32>
    %30 = arith.addf %27, %29 : vector<16x128xf32>
    %31 = arith.truncf %30 : vector<16x128xf32> to vector<16x128xbf16>
    %c0_19 = arith.constant 0 : index
    %c0_20 = arith.constant 0 : index
    %32 = vector.load %arg8[%c0_19, %c0_20] : memref<16x128xbf16, #tpu.memory_space<vmem>>, vector<16x128xbf16>
    tpu.vector_store %arg8[%c0_19, %c0_20], %31 {strides = array<i32>} : memref<16x128xbf16, #tpu.memory_space<vmem>>, vector<16x128xbf16>,
    return
  }
  func.func @transform_0(%arg0: i32) -> (i32, i32) {
    %c0_i32 = arith.constant 0 : i32
    %c0_i32_0 = arith.constant 0 : i32
    return %arg0, %c0_i32 : i32, i32
  }
  func.func @transform_1(%arg0: i32) -> (i32, i32) {
    %c0_i32 = arith.constant 0 : i32
    %c0_i32_0 = arith.constant 0 : i32
    %c0_i32_1 = arith.constant 0 : i32
    return %c0_i32, %c0_i32_0 : i32, i32
  }
  func.func @transform_2(%arg0: i32) -> (i32, i32) {
    %c0_i32 = arith.constant 0 : i32
    %c0_i32_0 = arith.constant 0 : i32
    %c0_i32_1 = arith.constant 0 : i32
    return %c0_i32, %c0_i32_0 : i32, i32
  }
  func.func @transform_3(%arg0: i32) -> (i32, i32) {
    %c0_i32 = arith.constant 0 : i32
    %c0_i32_0 = arith.constant 0 : i32
    %c0_i32_1 = arith.constant 0 : i32
    return %c0_i32, %c0_i32_0 : i32, i32
  }
  func.func @transform_4(%arg0: i32) -> (i32, i32) {
    %c0_i32 = arith.constant 0 : i32
    %c0_i32_0 = arith.constant 0 : i32
    %c0_i32_1 = arith.constant 0 : i32
    return %c0_i32, %c0_i32_0 : i32, i32
  }
  func.func @transform_5(%arg0: i32) -> (i32, i32) {
    %c0_i32 = arith.constant 0 : i32
    %c0_i32_0 = arith.constant 0 : i32
    %c0_i32_1 = arith.constant 0 : i32
    return %c0_i32, %c0_i32_0 : i32, i32
  }
  func.func @transform_6(%arg0: i32) -> (i32, i32) {
    %c0_i32 = arith.constant 0 : i32
    %c0_i32_0 = arith.constant 0 : i32
    %c0_i32_1 = arith.constant 0 : i32
    return %c0_i32, %c0_i32_0 : i32, i32
  }
  func.func @transform_7(%arg0: i32) -> (i32, i32) {
    %c0_i32 = arith.constant 0 : i32
    %c0_i32_0 = arith.constant 0 : i32
    return %arg0, %c0_i32 : i32, i32
  }
}

</mosaic_0001>

<bundles_post_ra>
// kernel: decoder_roi_forward.1
= control target key start
LH: loop header
LB: loop body
LE: loop exit
PB: predicated region body
PF: predicated region fallthrough
CT: control target
= control target key end

     0   :  { %12 = vsyncpa [#allocation3], 0  ;;  %s700_s0 = inlined_call_operand.vmem [shape: f32[16,32], index: 0, kind: input, shape index: {}]   ;;  %s701_s1 = inlined_call_operand.vmem [shape: bf16[32,128], index: 1, kind: input, shape index: {}]   ;;  %s702_s2 = inlined_call_operand.vmem [shape: f32[1,128], index: 2, kind: input, shape index: {}]   ;;  %s703_s3 = inlined_call_operand.hbm [shape: bf16[128,128], index: 3, kind: input, shape index: {}]   ;;  %s704_s4 = inlined_call_operand.vmem [shape: f32[1,128], index: 4, kind: input, shape index: {}]   ;;  %s705_s5 = inlined_call_operand.hbm [shape: bf16[128,128], index: 5, kind: input, shape index: {}]   ;;  %s706_s6 = inlined_call_operand.vmem [shape: f32[1,128], index: 6, kind: input, shape index: {}]   ;;  %s707_s7 = inlined_call_operand.vmem [shape: bf16[16,128], index: 7, kind: output, shape index: {}]  }
   0x1   :  { %13 = vsyncpa [#allocation5], 0  ;;  %s582_s24 = smov [#allocation2]   ;;  %s534_s28 = scalar_lea.hbm %s703_s3, 1024 }
   0x2   :  { %s25_s25 = sshll.u32 %s582_s24, 4  ;;  %p535_p0 = scmp.ne.s32.totalorder %s703_s3, %s534_s28  ;;  %s26_s25 = int_to_ptr.vmem [resolvable:$true] %s25_s25 }
   0x3   :  { %p538_p1 = scmp.lt.u32.totalorder %s534_s28, %s703_s3 }
   0x5   :  { %p540_p2 = pnand %p538_p1, %p535_p0 }
   0x7   :  { %543 = shalt.err (!%p540_p2)
}
   0x8   :  { %s544_s10 = scalar_lea.vmem %s26_s25, 1024  ;;  %p549_p4 = scmp.lt.s32.totalorder %s26_s25, %s26_s25 }
   0x9   :  { %p545_p3 = scmp.ne.s32.totalorder %s26_s25, %s544_s10  ;;  %p550_p5 = scmp.lt.s32.totalorder %s544_s10, %s544_s10 }
   0xb   :  { %p551_p6 = por %p550_p5, %p549_p4 }
   0xd   :  { %p552_p7 = pnand %p551_p6, %p545_p3 }
   0xf   :  { %555 = shalt.err (!%p552_p7)
}
  0x10   :  { %s583_s11 = smov 64   ;;  %s584_s12 = smov 4  }
  0x11   :  { %31 = dma.hbm_to_vmem [thread:$0]  %s703_s3, 1024, %s26_s25, [#allocation3], %s583_s11, %s583_s11, %s584_s12  }
  0x12   :  { %s585_s15 = smov [#allocation4]   ;;  %s556_s19 = scalar_lea.hbm %s705_s5, 1024 }
  0x13   :  { %s39_s16 = sshll.u32 %s585_s15, 4  ;;  %p557_p8 = scmp.ne.s32.totalorder %s705_s5, %s556_s19  ;;  %s40_s16 = int_to_ptr.vmem [resolvable:$true] %s39_s16 }
  0x14   :  { %p560_p9 = scmp.lt.u32.totalorder %s556_s19, %s705_s5 }
  0x16   :  { %p562_p10 = pnand %p560_p9, %p557_p8 }
  0x18   :  { %565 = shalt.err (!%p562_p10)
}
  0x19   :  { %s566_s24 = scalar_lea.vmem %s40_s16, 1024  ;;  %p571_p12 = scmp.lt.s32.totalorder %s40_s16, %s40_s16 }
  0x1a   :  { %p567_p11 = scmp.ne.s32.totalorder %s40_s16, %s566_s24  ;;  %p572_p13 = scmp.lt.s32.totalorder %s566_s24, %s566_s24 }
  0x1c   :  { %p573_p0 = por %p572_p13, %p571_p12 }
  0x1e   :  { %p574_p1 = pnand %p573_p0, %p567_p11 }
  0x20   :  { %577 = shalt.err (!%p574_p1)
}
  0x21   :  { %45 = dma.hbm_to_vmem [thread:$0]  %s705_s5, 1024, %s40_s16, [#allocation5], %s583_s11, %s583_s11, %s584_s12  }
  0x22   :  { %578 = dma.done.wait [#allocation3], 1024  }
  0x23   :  { %579 = vsyncadd [#allocation3], 4294966272 }
  0x24   :  { %580 = dma.done.wait [#allocation5], 1024  }
  0x25   :  { %581 = vsyncadd [#allocation5], 4294966272  ;;  %v586_v0 = vmov 0.0   ;;  %vm587_vm0 = vmmov 0   ;;  %v508_v1 = vld [vmem:[%s701_s1] sm:$0xff]   ;;  %v509_v2 = vld [vmem:[%s701_s1 + $0x8] sm:$0xff]  }
  0x26   :  { %454 = vmatprep.subr.bf16.mxu0 %v586_v0  ;;  %458 = vmatprep.mubr.msk.bf16.mxu0 %vm587_vm0, %v586_v0  ;;  %v55_v3 = vld [vmem:[%s700_s0] sm:$0xff]  ;;  %v56_v4 = vld [vmem:[%s700_s0 + $0x8] sm:$0xff]  ;;  %v510_v5 = vld [vmem:[#allocation2] sm:$0xff]   ;;  %vm81_vm1 = vcmask 261120  }
  0x27   :  { %462 = vmatprep.subr.bf16.mxu1 %v586_v0  ;;  %478 = vmatprep.mubr.msk.bf16.mxu1 %vm587_vm0, %v586_v0  ;;  %v57_v6 = vpack.c.bf16 %v56_v4, %v55_v3  ;;  %v511_v7 = vld [vmem:[#allocation2 + $0x8] sm:$0xff]   ;;  %v512_v8 = vld [vmem:[#allocation2 + $0x10] sm:$0xff]   ;;  %v513_v9 = vld [vmem:[#allocation2 + $0x18] sm:$0xff]  }
  0x28   :  { %455 = vmatpush3.bf16.msra.mxu0 %v508_v1  ;;  %463 = vmatpush3.bf16.msra.mxu1 %v510_v5  ;;  %v514_v10 = vld [vmem:[#allocation2 + $0x20] sm:$0xff]   ;;  %v515_v11 = vld [vmem:[#allocation2 + $0x28] sm:$0xff]   ;;  %v516_v12 = vld [vmem:[#allocation2 + $0x30] sm:$0xff]  }
  0x29   :  { %456 = vmatprep.subr.bf16.mxu0 %v586_v0  ;;  %464 = vmatprep.subr.bf16.mxu1 %v586_v0  ;;  %v517_v13 = vld [vmem:[#allocation2 + $0x38] sm:$0xff]   ;;  %v518_v14 = vld [vmem:[#allocation4] sm:$0xff]   ;;  %v519_v15 = vld [vmem:[#allocation4 + $0x8] sm:$0xff]  }
  0x2a   :  { %v520_v16 = vld [vmem:[#allocation4 + $0x10] sm:$0xff]   ;;  %v521_v17 = vld [vmem:[#allocation4 + $0x18] sm:$0xff]   ;;  %v522_v18 = vld [vmem:[#allocation4 + $0x20] sm:$0xff]  }
  0x2b   :  { %v523_v19 = vld [vmem:[#allocation4 + $0x28] sm:$0xff]   ;;  %v402_v20 = vld [vmem:[%s702_s2] ss:$0 sm:$0xff]  ;;  %v525_v31 = vld [vmem:[#allocation4 + $0x38] sm:$0xff]  }
  0x2c   :  { %457 = vmatpush3.bf16.msra.mxu0 %v509_v2  ;;  %465 = vmatpush3.bf16.msra.mxu1 %v511_v7  ;;  %v524_v30 = vld [vmem:[#allocation4 + $0x30] sm:$0xff]  }
  0x2d   :  { %482 = vmatprep.subr.bf16.mxu0 %v586_v0  ;;  %466 = vmatprep.subr.bf16.mxu1 %v586_v0  ;;  %v406_v32 = vld [vmem:[%s704_s4] ss:$0 sm:$0xff] }
  0x2e   :  { %v415_v42 = vld [vmem:[%s706_s6] ss:$0 sm:$0xff] }
  0x2f   :  { %459 = vmatmul.mubr.msk.bf16.vlgmr.msra.gmra.mrb[0].mxu0 %vm81_vm1, %v57_v6 }
  0x30   :  { %498 = vmatprep.mubr.msk.bf16.mxu0 %vm587_vm0, %v586_v0  ;;  %467 = vmatpush3.bf16.msra.mxu1 %v512_v8 }
  0x31   :  { %468 = vmatprep.subr.bf16.mxu1 %v586_v0  ;;  %483 = vmatpush3.bf16.msra.mxu0 %v518_v14 }
  0x32   :  { %484 = vmatprep.subr.bf16.mxu0 %v586_v0 }
  0x34   :  { %469 = vmatpush3.bf16.msra.mxu1 %v513_v9 }
  0x35   :  { %470 = vmatprep.subr.bf16.mxu1 %v586_v0  ;;  %485 = vmatpush3.bf16.msra.mxu0 %v519_v15 }
  0x36   :  { %486 = vmatprep.subr.bf16.mxu0 %v586_v0 }
  0x38   :  { %471 = vmatpush3.bf16.msra.mxu1 %v514_v10 }
  0x39   :  { %472 = vmatprep.subr.bf16.mxu1 %v586_v0  ;;  %487 = vmatpush3.bf16.msra.mxu0 %v520_v16 }
  0x3a   :  { %488 = vmatprep.subr.bf16.mxu0 %v586_v0 }
  0x3c   :  { %473 = vmatpush3.bf16.msra.mxu1 %v515_v11 }
  0x3d   :  { %474 = vmatprep.subr.bf16.mxu1 %v586_v0  ;;  %489 = vmatpush3.bf16.msra.mxu0 %v521_v17 }
  0x3e   :  { %490 = vmatprep.subr.bf16.mxu0 %v586_v0 }
  0x40   :  { %475 = vmatpush3.bf16.msra.mxu1 %v516_v12 }
  0x41   :  { %476 = vmatprep.subr.bf16.mxu1 %v586_v0  ;;  %491 = vmatpush3.bf16.msra.mxu0 %v522_v18 }
  0x42   :  { %492 = vmatprep.subr.bf16.mxu0 %v586_v0 }
  0x44   :  { %477 = vmatpush3.bf16.msra.mxu1 %v517_v13 }
  0x45   :  { %493 = vmatpush3.bf16.msra.mxu0 %v523_v19 }
  0x46   :  { %494 = vmatprep.subr.bf16.mxu0 %v586_v0 }
  0x49   :  { %495 = vmatpush3.bf16.msra.mxu0 %v524_v30 }
  0x4a   :  { %496 = vmatprep.subr.bf16.mxu0 %v586_v0 }
  0x4d   :  { %497 = vmatpush3.bf16.msra.mxu0 %v525_v31 }
 0x102   :  { %v119_v21 = vpop.f32.mrb[0].mxu0 }
 0x103   :  { %v120_v22 = vadd.f32 %v402_v20, %v119_v21  ;;  %v460_v23 = vpop.f32.mrb[1].mxu0 }
 0x104   :  { %v122_v24 = vpop.f32.mrb[2].mxu0 }
 0x105   :  { %v123_v25 = vadd.f32 %v402_v20, %v122_v24  ;;  %v461_v26 = vpop.f32.mrb[3].mxu0  ;;  %v126_v27 = vmax.f32 %v120_v22, 0.0 }
 0x107   :  { %v127_v28 = vmax.f32 %v123_v25, 0.0 }
 0x109   :  { %v128_v29 = vpack.c.bf16 %v127_v28, %v126_v27 }
 0x10b   :  { %479 = vmatmul.mubr.bf16.vlgmr.msra.gmra.mrb[0].mxu1 %v128_v29 }
 0x1de   :  { %v234_v33 = vpop.f32.mrb[0].mxu1 }
 0x1df   :  { %v235_v34 = vadd.f32 %v406_v32, %v234_v33  ;;  %v480_v35 = vpop.f32.mrb[1].mxu1 }
 0x1e0   :  { %v237_v36 = vpop.f32.mrb[2].mxu1 }
 0x1e1   :  { %v238_v37 = vadd.f32 %v406_v32, %v237_v36  ;;  %v481_v38 = vpop.f32.mrb[3].mxu1  ;;  %v241_v39 = vmax.f32 %v235_v34, 0.0 }
 0x1e3   :  { %v242_v40 = vmax.f32 %v238_v37, 0.0 }
 0x1e5   :  { %v243_v41 = vpack.c.bf16 %v242_v40, %v241_v39 }
 0x1e7   :  { %499 = vmatmul.mubr.bf16.vlgmr.msra.gmra.mrb[4].mxu0 %v243_v41 }
 0x2ba   :  { %v349_v43 = vpop.f32.mrb[4].mxu0 }
 0x2bb   :  { %v350_v44 = vadd.f32 %v415_v42, %v349_v43  ;;  %v500_v45 = vpop.f32.mrb[5].mxu0 }
 0x2bc   :  { %v352_v46 = vpop.f32.mrb[6].mxu0 }
 0x2bd   :  { %v356_v47 = vand.u32 2147483647, %v350_v44  ;;  %v353_v48 = vadd.f32 %v415_v42, %v352_v46  ;;  %v501_v49 = vpop.f32.mrb[7].mxu0  ;;  %v382_v8 = vmax.f32 %v350_v44, 0.0 }
 0x2bf   :  { %v358_v50 = vsub.f32 0.0, %v356_v47  ;;  %v357_v51 = vand.u32 2147483647, %v353_v48  ;;  %v383_v9 = vmax.f32 %v353_v48, 0.0 }
 0x2c1   :  { %v360_v52 = vmul.f32 1.442695, %v358_v50  ;;  %v359_v53 = vsub.f32 0.0, %v357_v51 }
 0x2c3   :  { %526 = vpow2.f32 %v360_v52  ;;  %v362_v54 = vmul.f32 1.442695, %v359_v53 }
 0x2c5   :  { %528 = vpow2.f32 %v362_v54 }
 0x2cd   :  { %v527_v55 = vpop.eup %526 }
 0x2ce   :  { %v364_v56 = vadd.f32 1.0, %v527_v55  ;;  %v367_v59 = vmul.f32 -0.5, %v527_v55  ;;  %v370_v62 = vand.u32 2147483647, %v527_v55 }
 0x2cf   :  { %v529_v57 = vpop.eup %528 }
 0x2d0   :  { %530 = vlog2.f32 %v364_v56  ;;  %v373_v58 = vadd.f32 1.0, %v529_v57  ;;  %v376_v60 = vmul.f32 -0.5, %v529_v57  ;;  %v368_v61 = vadd.f32 1.0, %v367_v59 }
 0x2d1   :  { %v379_v1 = vand.u32 2147483647, %v529_v57  ;;  %vm371_vm2 = vcmp.lt.f32.partialorder %v370_v62, 0.0004427343 }
 0x2d2   :  { %532 = vlog2.f32 %v373_v58  ;;  %v377_v63 = vadd.f32 1.0, %v376_v60  ;;  %v369_v3 = vmul.f32 %v527_v55, %v368_v61 }
 0x2d3   :  { %vm380_vm3 = vcmp.lt.f32.partialorder %v379_v1, 0.0004427343 }
 0x2d4   :  { %v378_v7 = vmul.f32 %v529_v57, %v377_v63 }
 0x2da   :  { %v531_v0 = vpop.eup %530 }
 0x2db   :  { %v366_v2 = vmul.f32 0.6931472, %v531_v0 }
 0x2dc   :  { %v533_v4 = vpop.eup %532 }
 0x2dd   :  { %v372_v5 = vsel %vm371_vm2, %v369_v3, %v366_v2  ;;  %v375_v6 = vmul.f32 0.6931472, %v533_v4 }
 0x2de   :  { %v384_v11 = vadd.f32 %v382_v8, %v372_v5 }
 0x2df   :  { %v381_v10 = vsel %vm380_vm3, %v378_v7, %v375_v6 }
 0x2e0   :  { %v385_v12 = vadd.f32 %v383_v9, %v381_v10 }
 0x2e2   :  { %v431_v13 = vpack.c.bf16 %v385_v12, %v384_v11 }
 0x2e4   :  { %432 = vst [vmem:[%s707_s7] sm:$0xff] %v431_v13  }
 0x2e5   :  { %400 = vsyncpa [#allocation3], 1 }
 0x2e6   :  { %401 = vsyncpa [#allocation5], 1 }

</bundles_post_ra>
